<compile_context>
chip_gen: v7x
topology: tpu7x:2x2x1
jax: 0.10.0
libtpu: 0.0.40
codegen_flags: <defaults>
</compile_context>

<pallas_src>
import jax
import jax.numpy as jnp
import numpy as np
from jax.experimental import pallas as pl
from jax.experimental.pallas import tpu as pltpu


def _fuse_kernel(rgb_ref, depth_ref, g_rgb_ref, g_depth_ref, out_ref):
    # rgb_ref / depth_ref / out_ref : (TILE_R, TILE_HW) activation tiles (act dtype)
    # g_*_ref                       : (TILE_R, 1) f32 per-(batch*channel)-row gates
    r = rgb_ref[...].astype(jnp.float32)
    d = depth_ref[...].astype(jnp.float32)
    out_ref[...] = (r * g_rgb_ref[...] + d * g_depth_ref[...]).astype(out_ref.dtype)


def _round_up(x, m):
    return ((x + m - 1) // m) * m


def _compute_gate(x, w):
    """Global average pool + center tap of the k=3 Conv1d + sigmoid (f32)."""
    pooled = jnp.mean(x.astype(jnp.float32), axis=(2, 3))                  # (B, C)
    exc = jnp.einsum("oi,bi->bo", w[:, :, 1].astype(jnp.float32), pooled)  # (B, C)
    return jax.nn.sigmoid(exc)


def eca_fusion(rgb, depth, w_rgb, w_depth):
    """rgb, depth: (B, C, H, W). w_*: (C, C, 3) Conv1d weights (no bias)."""
    B, C, H, W = rgb.shape
    HW = H * W
    R = B * C
    dtype = rgb.dtype

    # ---- tiny gate compute, hoisted out of the HBM-bound Pallas kernel (f32) ----
    g_rgb = _compute_gate(rgb, w_rgb).reshape(R, 1)
    g_depth = _compute_gate(depth, w_depth).reshape(R, 1)

    # ---- lane-dense, spatially tiled elementwise fuse (no padding copies) ----
    rgb_f = rgb.reshape(R, HW)
    depth_f = depth.reshape(R, HW)

    LANE, SUB = 128, 8
    itemsize = jnp.dtype(dtype).itemsize
    # ~2 MiB per streamed activation tile; 3 arrays x 2 buffers x 2 MiB = 12 MiB,
    # within the default scoped VMEM on v5e (16 MiB) / v6e / v7x (32 MiB).
    target_tile_bytes = 2 * 1024 * 1024
    max_tile_elems = target_tile_bytes // itemsize

    TILE_HW = min(_round_up(HW, LANE), 2048)                 # lane-dense
    row_cap = max(SUB, (max_tile_elems // TILE_HW) // SUB * SUB)
    TILE_R = min(_round_up(R, SUB), row_cap)                 # sublane-aligned rows

    # v7x: guarantee >= 2 grid steps along a "parallel" axis so both TCs get work.
    if pl.cdiv(R, TILE_R) * pl.cdiv(HW, TILE_HW) < 2:
        if R > SUB:
            TILE_R = _round_up(pl.cdiv(R, 2), SUB)
        elif HW > LANE:
            TILE_HW = _round_up(pl.cdiv(HW, 2), LANE)
        # else: problem is tiny; a single step is fine.

    grid = (pl.cdiv(R, TILE_R), pl.cdiv(HW, TILE_HW))        # spatial axis innermost

    cost = pl.CostEstimate(
        flops=3 * R * HW,                                    # 2 mul + 1 add / elem
        transcendentals=0,
        bytes_accessed=3 * R * HW * itemsize + 2 * R * 4,
    )

    out_flat = pl.pallas_call(
        _fuse_kernel,
        out_shape=jax.ShapeDtypeStruct((R, HW), dtype),
        grid_spec=pltpu.PrefetchScalarGridSpec(
            num_scalar_prefetch=0,
            grid=grid,
            in_specs=[
                pl.BlockSpec((TILE_R, TILE_HW), lambda r, s: (r, s)),
                pl.BlockSpec((TILE_R, TILE_HW), lambda r, s: (r, s)),
                pl.BlockSpec((TILE_R, 1), lambda r, s: (r, 0)),
                pl.BlockSpec((TILE_R, 1), lambda r, s: (r, 0)),
            ],
            out_specs=pl.BlockSpec((TILE_R, TILE_HW), lambda r, s: (r, s)),
        ),
        compiler_params=pltpu.CompilerParams(
            dimension_semantics=("parallel", "parallel"),
        ),
        cost_estimate=cost,
    )(rgb_f, depth_f, g_rgb, g_depth)

    return out_flat.reshape(B, C, H, W)


def _eca_fusion_ref(rgb, depth, w_rgb, w_depth):
    """Pure-JAX reference matching the PyTorch forward."""
    def eca(x, w):
        y = jnp.mean(x, axis=(2, 3))                      # (B, C)
        y = jnp.einsum("oi,bi->bo", w[:, :, 1], y)        # Conv1d k=3 on len-1 seq
        y = jax.nn.sigmoid(y)
        return x * y[:, :, None, None]
    return eca(rgb, w_rgb) + eca(depth, w_depth)


if __name__ == "__main__":
    key = jax.random.PRNGKey(0)
    B, C, H, W = 2, 4, 16, 16

    k1, k2, k3, k4 = jax.random.split(key, 4)
    rgb = jax.random.normal(k1, (B, C, H, W), dtype=jnp.float32)
    depth = jax.random.normal(k2, (B, C, H, W), dtype=jnp.float32)

    # Deterministic Conv1d weights (channel, channel, 3), no bias — synthetic init.
    w_rgb = 0.1 * jax.random.normal(k3, (C, C, 3), dtype=jnp.float32)
    w_depth = 0.1 * jax.random.normal(k4, (C, C, 3), dtype=jnp.float32)

    out = eca_fusion(rgb, depth, w_rgb, w_depth)
    out = jax.block_until_ready(out)

    ref = _eca_fusion_ref(rgb, depth, w_rgb, w_depth)
    np.testing.assert_allclose(np.asarray(out), np.asarray(ref), rtol=1e-5, atol=1e-5)

    print("KERNEL_OK")
</pallas_src>

<mosaic_0001>
module attributes {stable_mosaic.version = 11 : i64} {
  func.func @_fuse_kernel(%arg0: i32, %arg1: i32, %arg2: memref<8x128xf32, #tpu.memory_space<vmem>>, %arg3: memref<8x128xf32, #tpu.memory_space<vmem>>, %arg4: memref<8x1xf32, #tpu.memory_space<vmem>>, %arg5: memref<8x1xf32, #tpu.memory_space<vmem>>, %arg6: memref<8x128xf32, #tpu.memory_space<vmem>>) attributes {dimension_semantics = [#tpu.dimension_semantics<parallel>, #tpu.dimension_semantics<parallel>], iteration_bounds = array<i64: 1, 2>, scalar_prefetch = 0 : i64, scratch_operands = 0 : i64, tpu.core_type = #tpu.core_type<tc>, window_params = [{transform_indices = @transform_0, window_bounds = array<i64: 8, 128>}, {transform_indices = @transform_1, window_bounds = array<i64: 8, 128>}, {transform_indices = @transform_2, window_bounds = array<i64: 8, 1>}, {transform_indices = @transform_3, window_bounds = array<i64: 8, 1>}, {transform_indices = @transform_4, window_bounds = array<i64: 8, 128>}]} {
    %c0 = arith.constant 0 : index
    %c0_0 = arith.constant 0 : index
    %0 = vector.load %arg2[%c0, %c0_0] : memref<8x128xf32, #tpu.memory_space<vmem>>, vector<8x128xf32>
    %c0_1 = arith.constant 0 : index
    %c0_2 = arith.constant 0 : index
    %1 = vector.load %arg3[%c0_1, %c0_2] : memref<8x128xf32, #tpu.memory_space<vmem>>, vector<8x128xf32>
    %c0_3 = arith.constant 0 : index
    %c0_4 = arith.constant 0 : index
    %2 = vector.load %arg4[%c0_3, %c0_4] : memref<8x1xf32, #tpu.memory_space<vmem>>, vector<8x1xf32>
    %3 = vector.broadcast %2 : vector<8x1xf32> to vector<8x128xf32>
    %4 = arith.mulf %0, %3 : vector<8x128xf32>
    %c0_5 = arith.constant 0 : index
    %c0_6 = arith.constant 0 : index
    %5 = vector.load %arg5[%c0_5, %c0_6] : memref<8x1xf32, #tpu.memory_space<vmem>>, vector<8x1xf32>
    %6 = vector.broadcast %5 : vector<8x1xf32> to vector<8x128xf32>
    %7 = arith.mulf %1, %6 : vector<8x128xf32>
    %8 = arith.addf %4, %7 : vector<8x128xf32>
    %c0_7 = arith.constant 0 : index
    %c0_8 = arith.constant 0 : index
    %9 = vector.load %arg6[%c0_7, %c0_8] : memref<8x128xf32, #tpu.memory_space<vmem>>, vector<8x128xf32>
    tpu.vector_store %arg6[%c0_7, %c0_8], %8 {strides = array<i32>} : memref<8x128xf32, #tpu.memory_space<vmem>>, vector<8x128xf32>,
    return
  }
  func.func @transform_0(%arg0: i32, %arg1: i32) -> (i32, i32) {
    %c0_i32 = arith.constant 0 : i32
    return %arg0, %arg1 : i32, i32
  }
  func.func @transform_1(%arg0: i32, %arg1: i32) -> (i32, i32) {
    %c0_i32 = arith.constant 0 : i32
    return %arg0, %arg1 : i32, i32
  }
  func.func @transform_2(%arg0: i32, %arg1: i32) -> (i32, i32) {
    %c0_i32 = arith.constant 0 : i32
    %c0_i32_0 = arith.constant 0 : i32
    return %arg0, %c0_i32 : i32, i32
  }
  func.func @transform_3(%arg0: i32, %arg1: i32) -> (i32, i32) {
    %c0_i32 = arith.constant 0 : i32
    %c0_i32_0 = arith.constant 0 : i32
    return %arg0, %c0_i32 : i32, i32
  }
  func.func @transform_4(%arg0: i32, %arg1: i32) -> (i32, i32) {
    %c0_i32 = arith.constant 0 : i32
    return %arg0, %arg1 : i32, i32
  }
}

</mosaic_0001>

<bundles_post_ra>
// kernel: tpu_custom_call.1
= control target key start
LH: loop header
LB: loop body
LE: loop exit
PB: predicated region body
PF: predicated region fallthrough
CT: control target
= control target key end

     0   :  { %9 = vsyncpa [#allocation3], 0  ;;  %s865_s0 = inlined_call_operand.vmem [shape: f32[8,256], index: 0, kind: input, shape index: {}]   ;;  %s866_s1 = inlined_call_operand.hbm [shape: f32[8,256], index: 1, kind: input, shape index: {}]   ;;  %s867_s2 = inlined_call_operand.vmem [shape: f32[8,1], index: 2, kind: input, shape index: {}]   ;;  %s868_s3 = inlined_call_operand.vmem [shape: f32[8,1], index: 3, kind: input, shape index: {}]   ;;  %s869_s4 = inlined_call_operand.hbm [shape: f32[8,256], index: 4, kind: output, shape index: {}]  }
   0x1   :  { %11 = vsyncpa [#allocation3 + $0x1], 0 }
   0x2   :  { %12 = vsyncpa [#allocation4], 0 }
   0x3   :  { %14 = vsyncpa [#allocation4 + $0x1], 0  ;;  %s682_s15 = smov 0   ;;  %s684_s16 = smov 0  }
   0x4   :  { %s686_s17 = smov 0   ;;  %s688_s18 = smov 0  }
   0x5   :  { %s690_s19 = smov 0   ;;  %s692_s20 = smov 0  }
   0x6 LB: > { %s460_s21 = sadd.s32 4294967295, %s652_s20   ;;  %s461_s22 = sadd.s32 4294967294, %s652_s20   ;;  %s652_s20 = sphi %s692_s20, %s20_s20   ;;  %s648_s19 = sphi %s690_s19, %s885_s19   ;;  %s644_s18 = sphi %s688_s18, %s884_s18   ;;  %s640_s17 = sphi %s686_s17, %s883_s17   ;;  %s636_s16 = sphi %s684_s16, %s882_s16   ;;  %s632_s15 = sphi %s682_s15, %s881_s15  }
   0x7   : > { %s29_s23 = sadd.s32 1, %s648_s19  ;;  %s69_s24 = sadd.s32 1, %s640_s17 }
   0x8   : > { %p30_p0 = scmp.ge.s32.totalorder %s29_s23, 2  ;;  %p76_p1 = scmp.ne.s32.totalorder %s640_s17, %s636_s16 }
   0x9   : > { %p77_p2 = scmp.eq.s32.totalorder %s652_s20, 0  ;;  %p82_p3 = scmp.ne.s32.totalorder %s636_s16, %s632_s15 }
   0xa   : > { %s887_s23 = smov (%p30_p0, %s29_s23), 0  ;;  %p83_p5 = scmp.eq.s32.totalorder %s460_s21, 0 }
   0xb   : > { %p723_p4 = por %p77_p2, %p76_p1  ;;  %s65_s26 = ssub.s32 %s648_s19, %s887_s23 }
   0xc   : > { %p160_p6 = scmp.eq.s32.totalorder %s460_s21, 1  ;;  %p67_p7 = scmp.eq.s32.totalorder %s65_s26, 0 }
   0xd   : > { %p729_p8 = por %p83_p5, %p82_p3  ;;  %p166_p10 = scmp.eq.s32.totalorder %s461_s22, 1 }
   0xe   : > { %p733_p9 = por %p160_p6, %p76_p1  ;;  %p488_p13 = scmp.lt.s32.totalorder %s652_s20, 2 }
   0xf   : > { %s738_s29 = scalar_select %p67_p7, %s640_s17, %s69_s24  }
  0x10   : > { %s873_s28 = scalar_select %p733_p9, 1, 0 }
  0x11   : > { %p740_p11 = por %p166_p10, %p82_p3  ;;  %s211_s5 = sand.u32 1, %s640_s17  }
  0x12   : > { %s466_s6 = sshll.u32 %s211_s5, 3  ;;  %s467_s7 = sshll.u32 %s648_s19, 7 }
  0x13   : > { %s874_s30 = scalar_select %p740_p11, 1, 0 }
  0x14   : > { %s751_s10 = scalar_lea.hbm %s866_s1, %s467_s7  ;;  %s215_s11 = scalar_lea.vmem [#allocation2], %s466_s6 }
  0x15   : > { %s224_s12 = sshll.u32 %s215_s11, 4  ;;  %p757_p0 = pnand %p488_p13, %p723_p4  ;;  %s753_s12 = int_to_ptr.vmem [resolvable:$true] %s224_s12 }
  0x16   : > { %s212_s14 = scalar_lea.sflag [#allocation3], %s211_s5  ;;  %s540_s21 = scalar_lea.hbm %s751_s10, 128 }
  0x17   : > { %p541_p3 = scmp.ne.s32.totalorder %s751_s10, %s540_s21  ;;  %p542_p5 = pneg %p757_p0 }
  0x18   : > { %s545_s25 = scalar_lea.hbm %s866_s1, 256  ;;  %p546_p4 = scmp.lt.u32.totalorder %s751_s10, %s866_s1 }
  0x19   : > { %p543_p6 = pnand %p542_p5, %p541_p3  ;;  %p547_p10 = scmp.lt.u32.totalorder %s545_s25, %s540_s21 }
  0x1a   : > { %p549_p12 = scmp.lt.u32.totalorder %s540_s21, %s751_s10 }
  0x1b   : > { %p544_p7 = pneg %p543_p6  ;;  %p548_p13 = por %p547_p10, %p546_p4 }
  0x1d   : > { %p550_p1 = por %p549_p12, %p548_p13 }
  0x1f   : > { %p551_p2 = pnand %p550_p1, %p544_p7 }
  0x21   : > { %554 = shalt.err (!%p551_p2)
}
  0x22   : > { %s555_s5 = scalar_lea.vmem %s753_s12, 128  ;;  %s654_s7 = smov [#allocation2]  }
  0x23   : > { %p556_p3 = scmp.ne.s32.totalorder %s753_s12, %s555_s5  ;;  %s560_s8 = sshll.u32 %s654_s7, 4  ;;  %s561_s8 = int_to_ptr.vmem [resolvable:$false] %s560_s8 }
  0x24   : > { %s562_s9 = scalar_lea.vmem %s561_s8, 256  ;;  %p563_p9 = scmp.lt.s32.totalorder %s753_s12, %s561_s8 }
  0x25   : > { %p558_p6 = pnand %p556_p3, %p542_p5  ;;  %p564_p4 = scmp.lt.s32.totalorder %s562_s9, %s555_s5 }
  0x27   : > { %p559_p11 = pneg %p558_p6  ;;  %p565_p10 = por %p564_p4, %p563_p9 }
  0x29   : > { %p566_p12 = pnand %p565_p10, %p559_p11 }
  0x2b   : > { %569 = shalt.err (!%p566_p12)
}
  0x2c   : > { %483 = dma.hbm_to_vmem [thread:$0]  (!%p757_p0), %s751_s10, 128, %s753_s12, %s212_s14  }
  0x2d   : > { %p876_p1 = scmp.lt.s32.totalorder %s652_s20, 3  ;;  %p877_p2 = scmp.ge.s32.totalorder %s652_s20, 1 }
  0x2f   : > { %p230_p5 = pnand %p877_p2, %p876_p1 }
  0x30   : > { %s793_s11 = sand.u32 (!%p230_p5), 1, %s636_s16  }
  0x31   : > { %233 = sbr.rel (%p230_p5) target bundleno = 209 (0xd1), region = 36  ;;  %s469_s21 = sshll.u32 (!%p230_p5), %s793_s11, 3 }
  0x32   : > { %s236_s22 = scalar_lea.sflag (!%p230_p5), [#allocation3], %s793_s11  ;;  %s239_s24 = scalar_lea.vmem (!%p230_p5), [#allocation2], %s469_s21 }
  0x38   : > { %623 = dma.done.wait (%p729_p8), %s236_s22, 128  }
  0x39   : > { %625 = vsyncadd (%p729_p8), %s236_s22, 4294967168  ;;  %v655_v0 = vmov 0   ;;  %v298_v1 = vld [vmem:[%s867_s2] sm:$0xff]  ;;  %p282_p9 = scmp.lt.s32.totalorder %s644_s18, 1  ;;  %s473_s7 = sshll.u32 %s644_s18, 7 }
  0x3a   : > { %539 = vset.pattern.permute.xlu0 %v655_v0  ;;  %v305_v2 = vld [vmem:[%s868_s3] sm:$0xff]  ;;  %s279_s8 = scalar_lea.vmem [#allocation5], %s469_s21  ;;  %s816_s12 = scalar_lea.hbm %s869_s4, %s473_s7 }
  0x3b   : > { %301 = vperm.xlu0 %539, %v298_v1   ;;  %s283_s25 = scalar_select %p282_p9, %s644_s18, 1  ;;  %v297_v5 = vld [vmem:[%s239_s24] sm:$0xff] }
  0x3c   : > { %s330_s9 = sshll.u32 %s279_s8, 4  ;;  %s315_s13 = scalar_lea.sflag [#allocation4], %s793_s11  ;;  %s818_s9 = int_to_ptr.vmem [resolvable:$true] %s330_s9 }
  0x3d   : > { %s471_s27 = sshll.u32 %s283_s25, 3  ;;  %s570_s24 = scalar_lea.vmem %s818_s9, 128 }
  0x3e   : > { %s287_s5 = scalar_lea.vmem %s865_s0, %s471_s27  ;;  %p571_p8 = scmp.ne.s32.totalorder %s818_s9, %s570_s24 }
  0x3f   : > { %308 = vperm.xlu0 %539, %v305_v2   ;;  %v296_v4 = vld [vmem:[%s287_s5] sm:$0xff]  ;;  %p878_p11 = scmp.ne.s32.totalorder %s873_s28, 0  ;;  %s656_s18 = smov [#allocation5]  }
  0x40   : > { %s574_s21 = sshll.u32 %s656_s18, 4  ;;  %s575_s21 = int_to_ptr.vmem [resolvable:$false] %s574_s21 }
  0x41   : > { %p572_p0 = pnand %p571_p8, %p878_p11  ;;  %s576_s14 = scalar_lea.vmem %s575_s21, 256 }
  0x42   : > { %p577_p13 = scmp.lt.s32.totalorder %s818_s9, %s575_s21  ;;  %p578_p3 = scmp.lt.s32.totalorder %s576_s14, %s570_s24 }
  0x43   : > { %p573_p7 = pneg %p572_p0 }
  0x44   : > { %p579_p6 = por %p578_p3, %p577_p13 }
  0x46   : > { %p580_p4 = pnand %p579_p6, %p573_p7 }
  0xba   : > { %v302_v3 = vpop.permute.xlu0 %301 }
  0xbb   : > { %v304_v7 = vmul.f32 %v302_v3, %v296_v4 }
  0xbe   : > { %v309_v6 = vpop.permute.xlu0 %308 }
  0xbf   : > { %v311_v8 = vmul.f32 %v309_v6, %v297_v5 }
  0xc1   : > { %v312_v9 = vadd.f32 %v311_v8, %v304_v7 }
  0xc3   : > { %313 = vst [vmem:[%s279_s8] sm:$0xff] %v312_v9 }
  0xc4   : > { %583 = shalt.err (!%p580_p4)
}
  0xc5   : > { %s584_s11 = scalar_lea.hbm %s816_s12, 128  ;;  %s588_s26 = scalar_lea.hbm %s869_s4, 256 }
  0xc6   : > { %p585_p10 = scmp.ne.s32.totalorder %s816_s12, %s584_s11  ;;  %p589_p2 = scmp.lt.u32.totalorder %s816_s12, %s869_s4 }
  0xc7   : > { %p590_p5 = scmp.lt.u32.totalorder %s588_s26, %s584_s11  ;;  %p592_p8 = scmp.lt.u32.totalorder %s584_s11, %s816_s12 }
  0xc8   : > { %p586_p12 = pnand %p585_p10, %p878_p11 }
  0xc9   : > { %p591_p9 = por %p590_p5, %p589_p2 }
  0xca   : > { %p587_p1 = pneg %p586_p12 }
  0xcb   : > { %p593_p0 = por %p592_p8, %p591_p9 }
  0xcd   : > { %p594_p7 = pnand %p593_p0, %p587_p1 }
  0xcf   : > { %597 = shalt.err (!%p594_p7)
}
  0xd0   : > { %478 = dma.vmem_to_hbm [thread:$0]  (%p878_p11), %s818_s9, 128, %s816_s12, %s315_s13  }
  0xd1 PF: > { %s342_s7 = sand.u32 1, %s632_s15   ;;  %p879_p13 = scmp.ne.s32.totalorder %s874_s30, 0 }
  0xd2   : > { %p880_p3 = scmp.ge.s32.totalorder %s652_s20, 2  ;;  %s343_s8 = scalar_lea.sflag [#allocation4], %s342_s7 }
  0xd4   : > { %p485_p6 = pnand %p880_p3, %p879_p13 }
  0xd6   : > { %627 = dma.done.wait (!%p485_p6), %s343_s8, 128  }
  0xd7   : > { %629 = vsyncadd (!%p485_p6), %s343_s8, 4294967168  ;;  %s20_s20 = sadd.s32 1, %s652_s20   ;;  %s881_s15 = smov %s636_s16 }
  0xd8   : > { %p17_p4 = scmp.ge.s32.totalorder %s20_s20, 4   ;;  %s882_s16 = smov %s640_s17 }
  0xd9   : > { %s883_s17 = smov %s738_s29  ;;  %s884_s18 = smov %s648_s19 }
  0xda   : > { %s885_s19 = smov %s887_s23  ;;  %19 = sbr.rel (!%p17_p4) target bundleno = 6 (0x6), region = 90 }
  0xe1   :  { %348 = vsyncpa [#allocation3], 1 }
  0xe2   :  { %350 = vsyncpa [#allocation3 + $0x1], 1 }
  0xe3   :  { %351 = vsyncpa [#allocation4], 1 }
  0xe4   :  { %353 = vsyncpa [#allocation4 + $0x1], 1 }

</bundles_post_ra>
